<compile_context>
chip_gen: v5e
topology: v5e:2x2
jax: 0.10.0
libtpu: 0.0.40
codegen_flags: <defaults>
</compile_context>

<pallas_src>
import math
import jax
import jax.numpy as jnp
from jax.experimental import pallas as pl
from jax.experimental.pallas import tpu as pltpu


LANE = 128
_VMEM_LIMIT = 32 * 1024 * 1024  # safe on v5e/v6e/v7x; footprint here is only a few MiB


def _round_up(v, m):
    return (v + m - 1) // m * m


def _pick_row_tile(Np):
    """Row tile of adj (parallel axis). Ensure >= 2 grid steps so v7x's 2 TCs both work."""
    tm = 256 if Np % 256 == 0 else 128
    if Np // tm < 2:
        tm = max(Np // 2, 8)
    return tm


def _pick_col_tile(Np):
    """Column (contraction) tile of adj; Np is always a multiple of 128."""
    for tn in (512, 256, 128):
        if Np % tn == 0:
            return tn
    return Np


# --------------------------------------------------------------------------------------
# Kernels
# --------------------------------------------------------------------------------------

def _support_kernel(x_ref, w_ref, s_ref):
    # s = x_packed @ W_block   (bf16 operands, f32 MXU accumulate, stored bf16)
    s_ref[...] = jnp.dot(x_ref[...], w_ref[...],
                         preferred_element_type=jnp.float32).astype(s_ref.dtype)


def _agg_kernel_fused_w(adj_ref, x_ref, w_ref, o_ref, acc_ref):
    # Path A (reassociated):  out = relu( (adj @ x_packed) @ W_block )
    # adj_ref: (tm, tn) bf16   x_ref: (tn, Wp_in) bf16   w_ref: (Wp_in, Wp_out) bf16
    # o_ref:   (tm, Wp_out)    acc_ref: (tm, Wp_in) f32 scratch
    n = pl.program_id(1)

    @pl.when(n == 0)
    def _init():
        acc_ref[...] = jnp.zeros_like(acc_ref)

    acc_ref[...] += jnp.dot(adj_ref[...], x_ref[...],
                            preferred_element_type=jnp.float32)

    @pl.when(n == pl.num_programs(1) - 1)
    def _finalize():
        out = jnp.dot(acc_ref[...].astype(w_ref.dtype), w_ref[...],
                      preferred_element_type=jnp.float32)
        o_ref[...] = jnp.maximum(out, 0.0).astype(o_ref.dtype)


def _agg_kernel_pre_w(adj_ref, s_ref, o_ref, acc_ref):
    # Path B (support precomputed):  out = relu( adj @ sup_packed )
    # adj_ref: (tm, tn) bf16   s_ref: (tn, Wp_out) bf16
    # o_ref:   (tm, Wp_out)    acc_ref: (tm, Wp_out) f32 scratch
    n = pl.program_id(1)

    @pl.when(n == 0)
    def _init():
        acc_ref[...] = jnp.zeros_like(acc_ref)

    acc_ref[...] += jnp.dot(adj_ref[...], s_ref[...],
                            preferred_element_type=jnp.float32)

    @pl.when(n == pl.num_programs(1) - 1)
    def _finalize():
        o_ref[...] = jnp.maximum(acc_ref[...], 0.0).astype(o_ref.dtype)


# --------------------------------------------------------------------------------------
# Wrapper
# --------------------------------------------------------------------------------------

def graph_convolution(x, adj, weight, *, mxu_dtype=jnp.bfloat16):
    """x: [K, N, Fin], adj: [N, N] (dense normalized adjacency), weight: [Fin, Fout]
    -> relu(adj @ (x @ W)) per MIMO slice, shape [K, N, Fout]."""
    K, N, Fin = x.shape
    Fin_w, Fout = weight.shape
    assert Fin_w == Fin

    out_dtype = x.dtype

    Np = _round_up(N, LANE)
    Win, Wout = K * Fin, K * Fout
    Wp_in = _round_up(Win, LANE)
    Wp_out = _round_up(Wout, LANE)

    # --- joint MIMO packing: x_packed[n, k*Fin + f] = x[k, n, f] --------------------
    x2d = jnp.transpose(x, (1, 0, 2)).reshape(N, Win)
    if (Np, Wp_in) != (N, Win):
        x2d = jnp.zeros((Np, Wp_in), x.dtype).at[:N, :Win].set(x2d)
    x2d = x2d.astype(mxu_dtype)

    if Np != N:
        adj_p = jnp.zeros((Np, Np), adj.dtype).at[:N, :N].set(adj)
    else:
        adj_p = adj
    adj_p = adj_p.astype(mxu_dtype)

    # Block-diagonal shared weight for the packed layout (tiny: (K*Fin, K*Fout)).
    w_block = jnp.kron(jnp.eye(K, dtype=weight.dtype), weight)
    if (Wp_in, Wp_out) != (Win, Wout):
        w_block = jnp.zeros((Wp_in, Wp_out), weight.dtype).at[:Win, :Wout].set(w_block)
    w_block = w_block.astype(mxu_dtype)

    tm = _pick_row_tile(Np)
    tn = _pick_col_tile(Np)

    # Pick the association that minimizes the dominant O(N^2 * width) adj contraction
    # using the *padded packed* widths.
    fuse_weight_in_kernel = Wp_in <= Wp_out

    compiler_params = pltpu.CompilerParams(
        dimension_semantics=("parallel", "arbitrary"),
        vmem_limit_bytes=_VMEM_LIMIT,
    )

    if fuse_weight_in_kernel:
        # Path A: (adj @ x_packed) @ W_block inside one kernel.
        out_p = pl.pallas_call(
            _agg_kernel_fused_w,
            out_shape=jax.ShapeDtypeStruct((Np, Wp_out), out_dtype),
            grid_spec=pltpu.PrefetchScalarGridSpec(
                num_scalar_prefetch=0,
                grid=(Np // tm, Np // tn),
                in_specs=[
                    pl.BlockSpec((tm, tn), lambda m, n: (m, n)),        # adj tile
                    pl.BlockSpec((tn, Wp_in), lambda m, n: (n, 0)),     # packed x tile
                    pl.BlockSpec((Wp_in, Wp_out), lambda m, n: (0, 0)), # block-diag W
                ],
                out_specs=pl.BlockSpec((tm, Wp_out), lambda m, n: (m, 0)),
                scratch_shapes=[pltpu.VMEM((tm, Wp_in), jnp.float32)],
            ),
            compiler_params=compiler_params,
        )(adj_p, x2d, w_block)
    else:
        # Path B: hoist the support matmul (x_packed @ W_block) into its own tiny
        # kernel so it is computed exactly once (not once per adj row tile).
        tr = 256 if Np % 256 == 0 else 128
        sup = pl.pallas_call(
            _support_kernel,
            out_shape=jax.ShapeDtypeStruct((Np, Wp_out), mxu_dtype),
            grid_spec=pltpu.PrefetchScalarGridSpec(
                num_scalar_prefetch=0,
                grid=(Np // tr,),
                in_specs=[
                    pl.BlockSpec((tr, Wp_in), lambda r: (r, 0)),
                    pl.BlockSpec((Wp_in, Wp_out), lambda r: (0, 0)),
                ],
                out_specs=pl.BlockSpec((tr, Wp_out), lambda r: (r, 0)),
            ),
            compiler_params=pltpu.CompilerParams(
                dimension_semantics=("parallel",),
                vmem_limit_bytes=_VMEM_LIMIT,
            ),
        )(x2d, w_block)

        out_p = pl.pallas_call(
            _agg_kernel_pre_w,
            out_shape=jax.ShapeDtypeStruct((Np, Wp_out), out_dtype),
            grid_spec=pltpu.PrefetchScalarGridSpec(
                num_scalar_prefetch=0,
                grid=(Np // tm, Np // tn),
                in_specs=[
                    pl.BlockSpec((tm, tn), lambda m, n: (m, n)),     # adj tile
                    pl.BlockSpec((tn, Wp_out), lambda m, n: (n, 0)), # support tile
                ],
                out_specs=pl.BlockSpec((tm, Wp_out), lambda m, n: (m, 0)),
                scratch_shapes=[pltpu.VMEM((tm, Wp_out), jnp.float32)],
            ),
            compiler_params=compiler_params,
        )(adj_p, sup)

    # Unpack: out_packed[n, k*Fout + o] = out[k, n, o].
    if (Np, Wp_out) != (N, Wout):
        out_p = out_p[:N, :Wout]
    return jnp.transpose(out_p.reshape(N, K, Fout), (1, 0, 2))


def xavier_uniform(key, fan_in, fan_out, dtype=jnp.float32):
    limit = math.sqrt(6.0 / (fan_in + fan_out))
    return jax.random.uniform(key, (fan_in, fan_out), dtype=dtype,
                              minval=-limit, maxval=limit)


if __name__ == "__main__":
    def run_case(key, K, N, Fin, Fout):
        k_x, k_adj, k_w = jax.random.split(key, 3)
        x = jax.random.normal(k_x, (K, N, Fin), dtype=jnp.float32)

        # Symmetric, row-normalized adjacency (typical GCN adj), dense.
        a = (jax.random.uniform(k_adj, (N, N)) > 0.7).astype(jnp.float32)
        a = jnp.maximum(a, a.T) + jnp.eye(N, dtype=jnp.float32)
        adj = a / jnp.sum(a, axis=1, keepdims=True)

        weight = xavier_uniform(k_w, Fin, Fout)

        out = jax.block_until_ready(graph_convolution(x, adj, weight))

        ref = jnp.maximum(
            jnp.einsum("nm,kmf->knf", adj,
                       jnp.einsum("kni,io->kno", x, weight)), 0.0)
        assert out.shape == (K, N, Fout)
        # bf16 MXU operands -> loosened tolerance vs f32 reference.
        assert jnp.allclose(out, ref, atol=3e-2, rtol=3e-2), \
            float(jnp.max(jnp.abs(out - ref)))

    key = jax.random.PRNGKey(0)
    k1, k2 = jax.random.split(key)
    # MIMO K=2, 16 nodes, 8 -> 32 features (Path A: weight fused into the agg kernel).
    run_case(k1, K=2, N=16, Fin=8, Fout=32)
    # Wide-in / narrow-out (Path B: support precomputed by a separate tiny kernel).
    run_case(k2, K=2, N=24, Fin=72, Fout=8)

    print("KERNEL_OK")
</pallas_src>

<mosaic_0001>
module attributes {stable_mosaic.version = 11 : i64} {
  func.func @_agg_kernel_fused_w(%arg0: i32, %arg1: i32, %arg2: memref<64x128xbf16, #tpu.memory_space<vmem>>, %arg3: memref<128x128xbf16, #tpu.memory_space<vmem>>, %arg4: memref<128x128xbf16, #tpu.memory_space<vmem>>, %arg5: memref<64x128xf32, #tpu.memory_space<vmem>>, %arg6: memref<64x128xf32, #tpu.memory_space<vmem>>) attributes {dimension_semantics = [#tpu.dimension_semantics<parallel>, #tpu.dimension_semantics<arbitrary>], iteration_bounds = array<i64: 2, 1>, scalar_prefetch = 0 : i64, scratch_operands = 1 : i64, tpu.core_type = #tpu.core_type<tc>, window_params = [{transform_indices = @transform_0, window_bounds = array<i64: 64, 128>}, {transform_indices = @transform_1, window_bounds = array<i64: 128, 128>}, {pipeline_mode = #tpu.pipeline_mode<synchronous>, transform_indices = @transform_2, window_bounds = array<i64: 128, 128>}, {transform_indices = @transform_3, window_bounds = array<i64: 64, 128>}]} {
    %c0_i32 = arith.constant 0 : i32
    %0 = arith.cmpi eq, %arg1, %c0_i32 : i32
    %1 = arith.extui %0 : i1 to i32
    %c0_i32_0 = arith.constant 0 : i32
    %2 = arith.cmpi ne, %1, %c0_i32_0 : i32
    scf.if %2 {
      %cst_10 = arith.constant 0.000000e+00 : f32
      %12 = vector.broadcast %cst_10 : f32 to vector<64x128xf32>
      %c0_11 = arith.constant 0 : index
      %c0_12 = arith.constant 0 : index
      %13 = vector.load %arg6[%c0_11, %c0_12] : memref<64x128xf32, #tpu.memory_space<vmem>>, vector<64x128xf32>
      tpu.vector_store %arg6[%c0_11, %c0_12], %12 {strides = array<i32>} : memref<64x128xf32, #tpu.memory_space<vmem>>, vector<64x128xf32>,
    } else {
    }
    %c0 = arith.constant 0 : index
    %c0_1 = arith.constant 0 : index
    %3 = vector.load %arg6[%c0, %c0_1] : memref<64x128xf32, #tpu.memory_space<vmem>>, vector<64x128xf32>
    %c0_2 = arith.constant 0 : index
    %c0_3 = arith.constant 0 : index
    %4 = vector.load %arg2[%c0_2, %c0_3] : memref<64x128xbf16, #tpu.memory_space<vmem>>, vector<64x128xbf16>
    %c0_4 = arith.constant 0 : index
    %c0_5 = arith.constant 0 : index
    %5 = vector.load %arg3[%c0_4, %c0_5] : memref<128x128xbf16, #tpu.memory_space<vmem>>, vector<128x128xbf16>
    %cst = arith.constant dense<0.000000e+00> : vector<64x128xf32>
    %6 = tpu.matmul %4, %5, %cst {dimension_numbers = #tpu.dot_dimension_numbers<[1], [0], [0], [1], [0, 0, 1, 1], [], []>} : vector<64x128xbf16>, vector<128x128xbf16>, vector<64x128xf32> -> vector<64x128xf32>
    %7 = arith.addf %3, %6 : vector<64x128xf32>
    %c0_6 = arith.constant 0 : index
    %c0_7 = arith.constant 0 : index
    %8 = vector.load %arg6[%c0_6, %c0_7] : memref<64x128xf32, #tpu.memory_space<vmem>>, vector<64x128xf32>
    tpu.vector_store %arg6[%c0_6, %c0_7], %7 {strides = array<i32>} : memref<64x128xf32, #tpu.memory_space<vmem>>, vector<64x128xf32>,
    %c0_i32_8 = arith.constant 0 : i32
    %9 = arith.cmpi eq, %arg1, %c0_i32_8 : i32
    %10 = arith.extui %9 : i1 to i32
    %c0_i32_9 = arith.constant 0 : i32
    %11 = arith.cmpi ne, %10, %c0_i32_9 : i32
    scf.if %11 {
      %c0_10 = arith.constant 0 : index
      %c0_11 = arith.constant 0 : index
      %12 = vector.load %arg6[%c0_10, %c0_11] : memref<64x128xf32, #tpu.memory_space<vmem>>, vector<64x128xf32>
      %13 = arith.truncf %12 : vector<64x128xf32> to vector<64x128xbf16>
      %c0_12 = arith.constant 0 : index
      %c0_13 = arith.constant 0 : index
      %14 = vector.load %arg4[%c0_12, %c0_13] : memref<128x128xbf16, #tpu.memory_space<vmem>>, vector<128x128xbf16>
      %cst_14 = arith.constant dense<0.000000e+00> : vector<64x128xf32>
      %15 = tpu.matmul %13, %14, %cst_14 {dimension_numbers = #tpu.dot_dimension_numbers<[1], [0], [0], [1], [0, 0, 1, 1], [], []>} : vector<64x128xbf16>, vector<128x128xbf16>, vector<64x128xf32> -> vector<64x128xf32>
      %cst_15 = arith.constant 0.000000e+00 : f32
      %16 = vector.broadcast %cst_15 : f32 to vector<64x128xf32>
      %17 = arith.maximumf %15, %16 : vector<64x128xf32>
      %c0_16 = arith.constant 0 : index
      %c0_17 = arith.constant 0 : index
      %18 = vector.load %arg5[%c0_16, %c0_17] : memref<64x128xf32, #tpu.memory_space<vmem>>, vector<64x128xf32>
      tpu.vector_store %arg5[%c0_16, %c0_17], %17 {strides = array<i32>} : memref<64x128xf32, #tpu.memory_space<vmem>>, vector<64x128xf32>,
    } else {
    }
    return
  }
  func.func @transform_0(%arg0: i32, %arg1: i32) -> (i32, i32) {
    %c0_i32 = arith.constant 0 : i32
    return %arg0, %arg1 : i32, i32
  }
  func.func @transform_1(%arg0: i32, %arg1: i32) -> (i32, i32) {
    %c0_i32 = arith.constant 0 : i32
    %c0_i32_0 = arith.constant 0 : i32
    return %arg1, %c0_i32 : i32, i32
  }
  func.func @transform_2(%arg0: i32, %arg1: i32) -> (i32, i32) {
    %c0_i32 = arith.constant 0 : i32
    %c0_i32_0 = arith.constant 0 : i32
    %c0_i32_1 = arith.constant 0 : i32
    return %c0_i32, %c0_i32_0 : i32, i32
  }
  func.func @transform_3(%arg0: i32, %arg1: i32) -> (i32, i32) {
    %c0_i32 = arith.constant 0 : i32
    %c0_i32_0 = arith.constant 0 : i32
    return %arg0, %c0_i32 : i32, i32
  }
}

</mosaic_0001>

<bundles_post_ra>
// kernel: tpu_custom_call.1
= control target key start
LH: loop header
LB: loop body
LE: loop exit
PB: predicated region body
PF: predicated region fallthrough
CT: control target
= control target key end

     0   :  { %8 = vsyncpa [#allocation4], 0  ;;  %s1245_s0 = inlined_call_operand.hbm [shape: bf16[128,128], index: 0, kind: input, shape index: {}]   ;;  %s1246_s1 = inlined_call_operand.hbm [shape: bf16[128,128], index: 1, kind: input, shape index: {}]   ;;  %s1247_s2 = inlined_call_operand.hbm [shape: bf16[128,128], index: 2, kind: input, shape index: {}]   ;;  %s1248_s3 = inlined_call_operand.hbm [shape: f32[128,128], index: 3, kind: output, shape index: {}]  }
   0x1   :  { %10 = vsyncpa [#allocation4 + $0x1], 0 }
   0x2   :  { %11 = vsyncpa [#allocation7], 0 }
   0x3   :  { %12 = vsyncpa [#allocation5], 0 }
   0x4   :  { %14 = vsyncpa [#allocation5 + $0x1], 0  ;;  %s1083_s12 = smov 0   ;;  %s1085_s13 = smov 0  }
   0x5   :  { %s1087_s14 = smov 0   ;;  %s1089_s15 = smov 0  }
   0x6   :  { %s1091_s16 = smov 0   ;;  %s1093_s17 = smov 0  }
   0x7 LB: > { %s655_s18 = sadd.s32 4294967295, %s1055_s17   ;;  %s656_s19 = sadd.s32 4294967294, %s1055_s17   ;;  %s1055_s17 = sphi %s1093_s17, %s20_s17   ;;  %s1051_s16 = sphi %s1091_s16, %s1258_s16   ;;  %s1047_s15 = sphi %s1089_s15, %s1257_s15   ;;  %s1043_s14 = sphi %s1087_s14, %s1256_s14   ;;  %s1039_s13 = sphi %s1085_s13, %s1255_s13   ;;  %s1035_s12 = sphi %s1083_s12, %s1254_s12  }
   0x8   : > { %p54_p0 = scmp.ne.s32.totalorder %s1039_s13, %s1035_s12  ;;  %p1119_p1 = scmp.eq.s32.totalorder %s655_s18, 0 }
   0x9   : > { %p131_p2 = scmp.eq.s32.totalorder %s656_s19, 1  ;;  %p657_p4 = scmp.ge.s32.totalorder %s1055_s17, 1 }
   0xa   : > { %p1125_p3 = por %p1119_p1, %p54_p0  ;;  %p138_p6 = scmp.lt.s32.totalorder %s1055_s17, 3 }
   0xb   : > { %p1130_p5 = por %p131_p2, %p54_p0  ;;  %s152_s25 = sshll.u32 %s1246_s1, 4  ;;  %s153_s25 = int_to_ptr.hbm [resolvable:$true] %s152_s25 }
   0xc   : > { %p1138_p7 = pnand %p657_p4, %p138_p6  ;;  %s1057_s27 = smov [#allocation6]  }
   0xd   : > { %s154_s28 = sshll.u32 %s1057_s27, 4  ;;  %p660_p10 = scmp.ge.s32.totalorder %s1055_s17, 2  ;;  %s155_s28 = int_to_ptr.vmem [resolvable:$true] %s154_s28 }
   0xe   : > { %p804_p8 = pneg %p1138_p7  ;;  %s166_s4 = sshll.u32 %s1247_s2, 4  ;;  %s167_s4 = int_to_ptr.hbm [resolvable:$true] %s166_s4 }
   0xf   : > { %s1058_s5 = smov 64   ;;  %s1059_s6 = smov 4  }
  0x10   : > { %p805_p9 = pnand %p804_p8, %p1119_p1  ;;  %s1060_s7 = smov [#allocation8]  }
  0x11   : > { %s168_s8 = sshll.u32 %s1060_s7, 4  ;;  %p125_p11 = scmp.eq.s32.totalorder %s655_s18, 1  ;;  %s169_s8 = int_to_ptr.vmem [resolvable:$true] %s168_s8 }
  0x12   : > { %807 = dma.hbm_to_vmem [thread:$0]  (!%p805_p9), %s153_s25, 1024, %s155_s28, [#allocation7], %s1058_s5, %s1058_s5, %s1059_s6  }
  0x13   : > { %810 = dma.hbm_to_vmem [thread:$0]  (!%p805_p9), %s167_s4, 1024, %s169_s8, [#allocation7], %s1058_s5, %s1058_s5, %s1059_s6  }
  0x14   : > { %s32_s9 = sadd.s32 1, %s1051_s16  ;;  %s41_s10 = sadd.s32 1, %s1043_s14 }
  0x15   : > { %p34_p12 = scmp.ge.s32.totalorder %s32_s9, 2  ;;  %p48_p13 = scmp.ne.s32.totalorder %s1043_s14, %s1039_s13 }
  0x16   : > { %p49_p0 = scmp.eq.s32.totalorder %s1055_s17, 0  ;;  %p821_p4 = scmp.lt.s32.totalorder %s1055_s17, 2 }
  0x17   : > { %s1260_s9 = smov (%p34_p12, %s32_s9), 0  ;;  %p1165_p2 = por %p125_p11, %p48_p13 }
  0x18   : > { %s36_s19 = ssub.s32 %s1051_s16, %s1260_s9  ;;  %s182_s23 = sand.u32 1, %s1043_s14  }
  0x19   : > { %p39_p6 = scmp.eq.s32.totalorder %s36_s19, 0  ;;  %p50_p8 = por %p49_p0, %p48_p13 }
  0x1a   : > { %s661_s24 = sshll.u32 %s182_s23, 5  ;;  %s754_s18 = sshll.u32 %s1051_s16, 5 }
  0x1b   : > { %s1175_s25 = scalar_select %p39_p6, %s1043_s14, %s41_s10  }
  0x1c   : > { %s192_s29 = scalar_lea.hbm %s1245_s0, %s754_s18  ;;  %s186_s4 = scalar_lea.vmem [#allocation3], %s661_s24 }
  0x1d   : > { %s193_s30 = sshll.u32 %s192_s29, 4  ;;  %s195_s7 = sshll.u32 %s186_s4, 4  ;;  %s194_s30 = int_to_ptr.hbm [resolvable:$true] %s193_s30  ;;  %s196_s7 = int_to_ptr.vmem [resolvable:$true] %s195_s7 }
  0x1e   : > { %p812_p9 = pnand %p821_p4, %p50_p8  ;;  %s183_s8 = scalar_lea.sflag [#allocation4], %s182_s23 }
  0x1f   : > { %207 = sbr.rel (%p1138_p7) target bundleno = 375 (0x177), region = 32  ;;  %s1188_s10 = sand.u32 (!%p1138_p7), 1, %s1039_s13  }
  0x20   : > { %814 = dma.hbm_to_vmem [thread:$0]  (!%p812_p9), %s194_s30, 512, %s196_s7, %s183_s8, %s1058_s5, %s1058_s5, %s1059_s6  }
  0x21   : > { %s665_s19 = sshll.u32 (!%p1138_p7), %s1188_s10, 5  ;;  %s210_s24 = scalar_lea.sflag (!%p1138_p7), [#allocation4], %s1188_s10 }
  0x22   : > { %s1192_s18 = scalar_lea.vmem (!%p1138_p7), [#allocation3], %s665_s19 }
  0x24   : > { %1022 = dma.done.wait (%p1125_p3), %s210_s24, 512  }
  0x25   : > { %1024 = vsyncadd (%p1125_p3), %s210_s24, 4294966784 }
  0x26   : > { %1026 = dma.done.wait (%p1119_p1), [#allocation7], 2048  }
  0x27   : > { %1028 = vsyncadd (%p1119_p1), [#allocation7], 4294965248  ;;  %v766_v0 = vld [vmem:[#allocation6 + $0x38] sm:$0xff]  ;;  %v765_v1 = vld [vmem:[#allocation6 + $0x30] sm:$0xff]  ;;  %s668_s20 = sshll.u32 %s1188_s10, 6  ;;  %s775_s26 = sshll.u32 %s1047_s15, 6 }
  0x28   : > { %366 = vmatpush.bf16.msra.mxu0 %v766_v0  ;;  %776 = vmatpush.bf16.msra.mxu2 %v766_v0  ;;  %v764_v2 = vld [vmem:[#allocation6 + $0x28] sm:$0xff]  ;;  %v763_v3 = vld [vmem:[#allocation6 + $0x20] sm:$0xff]  ;;  %v762_v4 = vld [vmem:[#allocation6 + $0x18] sm:$0xff]  ;;  %s246_s21 = scalar_lea.vmem [#allocation9], %s668_s20  ;;  %s547_s23 = scalar_lea.hbm %s1248_s3, %s775_s26 }
  0x29   : > { %v774_v5 = vld [vmem:[#allocation8 + $0x38] sm:$0xff]  ;;  %v761_v6 = vld [vmem:[#allocation6 + $0x10] sm:$0xff]  ;;  %v760_v8 = vld [vmem:[#allocation6 + $0x8] sm:$0xff]  ;;  %s548_s27 = sshll.u32 %s246_s21, 4  ;;  %s550_s28 = sshll.u32 %s547_s23, 4  ;;  %s549_s27 = int_to_ptr.vmem [resolvable:$true] %s548_s27  ;;  %s551_s28 = int_to_ptr.hbm [resolvable:$true] %s550_s28 }
  0x2a   : > { %490 = vmatpush.bf16.msra.mxu1 %v774_v5  ;;  %v773_v7 = vld [vmem:[#allocation8 + $0x30] sm:$0xff]  ;;  %784 = vmatpush.bf16.msra.mxu3 %v774_v5  ;;  %v772_v9 = vld [vmem:[#allocation8 + $0x28] sm:$0xff]  ;;  %v759_v10 = vld [vmem:[#allocation6] sm:$0xff]  ;;  %s536_s29 = scalar_lea.sflag [#allocation5], %s1188_s10  ;;  %s983_s30 = sshra.s32 %s551_s28, 4  ;;  %s984_s30 = int_to_ptr.hbm [resolvable:$true] %s983_s30 }
  0x2b   : > { %v771_v11 = vld [vmem:[#allocation8 + $0x20] sm:$0xff]  ;;  %v757_v13 = vld [vmem:[%s1192_s18 + $0x10] sm:$0xff]  ;;  %v770_v14 = vld [vmem:[#allocation8 + $0x18] sm:$0xff]  ;;  %s985_s4 = scalar_lea.hbm %s984_s30, 64  ;;  %s989_s8 = scalar_lea.hbm %s1248_s3, 128 }
  0x2c   : > { %367 = vmatpush.bf16.msra.mxu0 %v765_v1  ;;  %777 = vmatpush.bf16.msra.mxu2 %v765_v1  ;;  %v755_v12 = vld [vmem:[%s1192_s18] sm:$0xff]  ;;  %v756_v15 = vld [vmem:[%s1192_s18 + $0x8] sm:$0xff]  ;;  %v758_v16 = vld [vmem:[%s1192_s18 + $0x18] sm:$0xff]  ;;  %p986_p1 = scmp.ne.s32.totalorder %s984_s30, %s985_s4  ;;  %p990_p11 = scmp.lt.s32.totalorder %s984_s30, %s1248_s3 }
  0x2d   : > { %v769_v17 = vld [vmem:[#allocation8 + $0x10] sm:$0xff]  ;;  %v768_v18 = vld [vmem:[#allocation8 + $0x8] sm:$0xff]  ;;  %v767_v19 = vld [vmem:[#allocation8] sm:$0xff]  ;;  %p991_p12 = scmp.lt.s32.totalorder %s989_s8, %s985_s4 }
  0x2e   : > { %491 = vmatpush.bf16.msra.mxu1 %v773_v7  ;;  %785 = vmatpush.bf16.msra.mxu3 %v773_v7  ;;  %p987_p3 = pnand %p986_p1, %p1165_p2 }
  0x2f   : > { %p992_p13 = por %p991_p12, %p990_p11 }
  0x30   : > { %368 = vmatpush.bf16.msra.mxu0 %v764_v2  ;;  %778 = vmatpush.bf16.msra.mxu2 %v764_v2  ;;  %p988_p7 = pneg %p987_p3 }
  0x32   : > { %492 = vmatpush.bf16.msra.mxu1 %v772_v9  ;;  %786 = vmatpush.bf16.msra.mxu3 %v772_v9  ;;  %p993_p0 = pnand %p992_p13, %p988_p7 }
  0x34   : > { %369 = vmatpush.bf16.msra.mxu0 %v763_v3  ;;  %779 = vmatpush.bf16.msra.mxu2 %v763_v3 }
  0x36   : > { %493 = vmatpush.bf16.msra.mxu1 %v771_v11  ;;  %787 = vmatpush.bf16.msra.mxu3 %v771_v11 }
  0x38   : > { %370 = vmatpush.bf16.msra.mxu0 %v762_v4  ;;  %780 = vmatpush.bf16.msra.mxu2 %v762_v4 }
  0x3a   : > { %494 = vmatpush.bf16.msra.mxu1 %v770_v14  ;;  %788 = vmatpush.bf16.msra.mxu3 %v770_v14 }
  0x3c   : > { %371 = vmatpush.bf16.msra.mxu0 %v761_v6  ;;  %781 = vmatpush.bf16.msra.mxu2 %v761_v6 }
  0x3e   : > { %495 = vmatpush.bf16.msra.mxu1 %v769_v17  ;;  %789 = vmatpush.bf16.msra.mxu3 %v769_v17 }
  0x40   : > { %372 = vmatpush.bf16.msra.mxu0 %v760_v8  ;;  %782 = vmatpush.bf16.msra.mxu2 %v760_v8 }
  0x42   : > { %496 = vmatpush.bf16.msra.mxu1 %v768_v18  ;;  %790 = vmatpush.bf16.msra.mxu3 %v768_v18 }
  0x44   : > { %373 = vmatpush.bf16.msra.mxu0 %v759_v10  ;;  %783 = vmatpush.bf16.msra.mxu2 %v759_v10 }
  0x46   : > { %497 = vmatpush.bf16.msra.mxu1 %v767_v19  ;;  %791 = vmatpush.bf16.msra.mxu3 %v767_v19 }
  0x47   : > { %374 = vmatmul.bf16.vlgmr.msra.gmra.mxu0 %v755_v12  ;;  %384 = vmatmul.bf16.vlgmr.msra.gmra.mxu2 %v757_v13 }
  0x57   : > { %379 = vmatmul.bf16.gmra.mxu0 %v756_v15  ;;  %389 = vmatmul.bf16.gmra.mxu2 %v758_v16 }
  0xc4   : > { %v375_v20 = vpop.f32.mrf.mxu0 }
  0xca   : > { %v385_v21 = vpop.f32.mrf.mxu2 }
  0xcc   : > { %v377_v22 = vpop.f32.mrf.mxu0 }
  0xcd   : > { %v422_v23 = vpack.c.bf16 %v377_v22, %v375_v20 }
  0xcf   : > { %498 = vmatmul.bf16.vlgmr.msra.gmra.mxu1 %v422_v23 }
  0xd2   : > { %v387_v24 = vpop.f32.mrf.mxu2 }
  0xd3   : > { %v424_v25 = vpack.c.bf16 %v387_v24, %v385_v21 }
  0xd4   : > { %v380_v26 = vpop.f32.mrf.mxu0 }
  0xd5   : > { %508 = vmatmul.bf16.vlgmr.msra.gmra.mxu3 %v424_v25 }
  0xda   : > { %v390_v27 = vpop.f32.mrf.mxu2 }
  0xdc   : > { %v382_v28 = vpop.f32.mrf.mxu0 }
  0xdd   : > { %v423_v29 = vpack.c.bf16 %v382_v28, %v380_v26 }
  0xdf   : > { %503 = vmatmul.bf16.gmra.mxu1 %v423_v29 }
  0xe2   : > { %v392_v30 = vpop.f32.mrf.mxu2 }
  0xe3   : > { %v425_v31 = vpack.c.bf16 %v392_v30, %v390_v27 }
  0xe5   : > { %513 = vmatmul.bf16.gmra.mxu3 %v425_v31 }
 0x14c   : > { %v499_v32 = vpop.f32.mrf.mxu1 }
 0x14d   : > { %v519_v33 = vmax.f32 %v499_v32, 0.0 }
 0x14f   : > { %527 = vst [vmem:[%s246_s21] sm:$0xff] %v519_v33 }
 0x154   : > { %v501_v34 = vpop.f32.mrf.mxu1 }
 0x155   : > { %v520_v35 = vmax.f32 %v501_v34, 0.0 }
 0x157   : > { %528 = vst [vmem:[%s246_s21 + $0x8] sm:$0xff] %v520_v35 }
 0x158   : > { %v509_v36 = vpop.f32.mrf.mxu3 }
 0x159   : > { %v523_v37 = vmax.f32 %v509_v36, 0.0 }
 0x15b   : > { %531 = vst [vmem:[%s246_s21 + $0x20] sm:$0xff] %v523_v37 }
 0x15c   : > { %v504_v38 = vpop.f32.mrf.mxu1 }
 0x15d   : > { %v521_v39 = vmax.f32 %v504_v38, 0.0 }
 0x15f   : > { %529 = vst [vmem:[%s246_s21 + $0x10] sm:$0xff] %v521_v39 }
 0x160   : > { %v511_v40 = vpop.f32.mrf.mxu3 }
 0x161   : > { %v524_v41 = vmax.f32 %v511_v40, 0.0 }
 0x163   : > { %532 = vst [vmem:[%s246_s21 + $0x28] sm:$0xff] %v524_v41 }
 0x164   : > { %v506_v42 = vpop.f32.mrf.mxu1 }
 0x165   : > { %v522_v43 = vmax.f32 %v506_v42, 0.0 }
 0x167   : > { %530 = vst [vmem:[%s246_s21 + $0x18] sm:$0xff] %v522_v43 }
 0x168   : > { %v514_v44 = vpop.f32.mrf.mxu3 }
 0x169   : > { %v525_v45 = vmax.f32 %v514_v44, 0.0 }
 0x16b   : > { %533 = vst [vmem:[%s246_s21 + $0x30] sm:$0xff] %v525_v45 }
 0x170   : > { %v516_v46 = vpop.f32.mrf.mxu3 }
 0x171   : > { %v526_v47 = vmax.f32 %v516_v46, 0.0 }
 0x173   : > { %534 = vst [vmem:[%s246_s21 + $0x38] sm:$0xff] %v526_v47 }
 0x174   : > { %996 = shalt.err (!%p993_p0)
}
 0x175   : > { %s1061_s10 = smov 128   ;;  %s1062_s18 = smov 8  }
 0x176   : > { %802 = dma.vmem_to_hbm [thread:$0]  (%p1165_p2), %s549_s27, 1024, %s551_s28, %s536_s29, %s1061_s10, %s1061_s10, %s1062_s18  }
 0x177 PF: > { %s565_s20 = sand.u32 1, %s1035_s12   ;;  %p816_p4 = pnand %p660_p10, %p1130_p5 }
 0x178   : > { %s566_s21 = scalar_lea.sflag [#allocation5], %s565_s20 }
 0x179   : > { %p817_p6 = pneg %p816_p4 }
 0x17b   : > { %1030 = dma.done.wait (%p817_p6), %s566_s21, 1024  }
 0x17c   : > { %1032 = vsyncadd (%p817_p6), %s566_s21, 4294966272  ;;  %s20_s17 = sadd.s32 1, %s1055_s17   ;;  %s1254_s12 = smov %s1039_s13 }
 0x17d   : > { %p17_p8 = scmp.ge.s32.totalorder %s20_s17, 4   ;;  %s1255_s13 = smov %s1043_s14 }
 0x17e   : > { %s1256_s14 = smov %s1175_s25  ;;  %s1257_s15 = smov %s1051_s16 }
 0x17f   : > { %s1258_s16 = smov %s1260_s9  ;;  %19 = sbr.rel (!%p17_p8) target bundleno = 7 (0x7), region = 94 }
 0x184   :  { %572 = vsyncpa [#allocation4], 1 }
 0x185   :  { %574 = vsyncpa [#allocation4 + $0x1], 1 }
 0x186   :  { %575 = vsyncpa [#allocation7], 1 }
 0x187   :  { %576 = vsyncpa [#allocation5], 1 }
 0x188   :  { %578 = vsyncpa [#allocation5 + $0x1], 1 }

</bundles_post_ra>
